<compile_context>
chip_gen: v6e
topology: v6e:2x2x1
jax: 0.10.0
libtpu: 0.0.40
codegen_flags: <defaults>
</compile_context>

<pallas_src>
import functools

import jax
import jax.numpy as jnp
from jax import lax
from jax.experimental import pallas as pl
from jax.experimental.pallas import tpu as pltpu


def _round_up(x, m):
    return ((x + m - 1) // m) * m


def _patch_embed_kernel(p_ref, w_ref, params_ref, o_ref, *, e_true):
    # p_ref:      [tm, K_pad]    bf16 im2col patches (zero-padded K columns)
    # w_ref:      [K_pad, E_pad] bf16 conv weight (zero-padded rows/cols)
    # params_ref: [8, E_pad]     f32; row 0 = conv bias, 1 = LN gamma, 2 = LN beta
    # o_ref:      [tm, E_pad]
    y = jnp.dot(p_ref[...], w_ref[...], preferred_element_type=jnp.float32)

    bias = params_ref[0:1, :]
    gamma = params_ref[1:2, :]
    beta = params_ref[2:3, :]
    y = y + bias                                # padded E columns stay exactly 0

    e_pad = y.shape[-1]
    inv_e = 1.0 / e_true
    # Padded columns of y are exactly 0, so the plain sum is already the sum
    # over valid columns.
    mean = jnp.sum(y, axis=-1, keepdims=True) * inv_e
    centered = y - mean
    if e_true == e_pad:
        sq = centered * centered
    else:
        # Mask padded columns (they hold -mean) out of the variance only.
        lane = lax.broadcasted_iota(jnp.int32, y.shape, 1)
        cv = jnp.where(lane < e_true, centered, 0.0)
        sq = cv * cv
    var = jnp.sum(sq, axis=-1, keepdims=True) * inv_e
    yn = centered * lax.rsqrt(var + 1e-5)       # nn.LayerNorm default eps
    o_ref[...] = (yn * gamma + beta).astype(o_ref.dtype)


def _im2col(x, k, stride, pad):
    """x: [B, C, H, W] -> patches [B, H_out*W_out, C*k*k] (C, kh, kw order, to
    match PyTorch Conv2d OIHW weight flattening)."""
    B, C, H, W = x.shape
    H_out = (H + 2 * pad - k) // stride + 1
    W_out = (W + 2 * pad - k) // stride + 1
    x_pad = jnp.pad(x, ((0, 0), (0, 0), (pad, pad), (pad, pad)))
    cols = []
    for kh in range(k):
        for kw in range(k):
            cols.append(
                x_pad[:, :, kh:kh + H_out * stride:stride,
                            kw:kw + W_out * stride:stride])  # [B, C, Ho, Wo]
    patches = jnp.stack(cols, axis=2)                        # [B, C, k*k, Ho, Wo]
    patches = patches.reshape(B, C * k * k, H_out * W_out)
    patches = jnp.transpose(patches, (0, 2, 1))              # [B, HW, C*k*k]
    return patches, H_out, W_out


def _choose_tm(M, K_pad, E_pad, budget_bytes=24 * 1024 * 1024):
    """Largest row tile (multiple of 16) whose double-buffered working set fits
    a conservative VMEM budget (safe on v7x's 64 MiB VMEM)."""
    m16 = _round_up(M, 16)
    candidates = [c for c in (1024, 512, 256, 128) if c <= m16]
    if not candidates:
        return m16
    for tm in candidates:
        need = (2 * tm * K_pad * 2       # patches, double-buffered, bf16
                + 2 * K_pad * E_pad * 2  # weight (resident, budget 2 bufs)
                + 2 * tm * E_pad * 4     # output, double-buffered, f32
                + 2 * 8 * E_pad * 4)     # params
        if need <= budget_bytes:
            return tm
    return candidates[-1]


@functools.partial(jax.jit, static_argnames=("patch_size", "stride"))
def overlap_patch_embed_forward(x, conv_w, conv_b, ln_g, ln_b, *, patch_size, stride):
    """Pallas implementation of overlap_patch_embed.forward.

    x:       [B, C, H, W]  (NCHW)
    conv_w:  [E, C, k, k]  (PyTorch OIHW)
    conv_b, ln_g, ln_b: [E]
    returns: (y [B, H_out*W_out, E], H_out, W_out)
    """
    B, C, H, W = x.shape
    E = conv_w.shape[0]
    k = patch_size
    pad = patch_size // 2
    out_dtype = x.dtype

    # TODO(synk): fuse the im2col into the Pallas kernel (x kept NCHW in HBM via
    # memory_space=pl.ANY + per-tile DMA of overlapping row slabs) to remove the
    # ~k^2/stride^2-inflated HBM round trip entirely.
    patches, H_out, W_out = _im2col(x.astype(jnp.bfloat16), k, stride, pad)
    M = B * H_out * W_out
    K = C * k * k

    # Lane-dense padding: contraction dim and embed dim to multiples of 128.
    K_pad = _round_up(K, 128)
    E_pad = _round_up(E, 128)

    tm = _choose_tm(M, K_pad, E_pad)
    M_pad = _round_up(M, tm)

    patches2d = patches.reshape(M, K)
    patches2d = jnp.pad(patches2d, ((0, M_pad - M), (0, K_pad - K)))   # bf16

    w2d = conv_w.reshape(E, K).T.astype(jnp.bfloat16)                  # [K, E]
    w2d = jnp.pad(w2d, ((0, K_pad - K), (0, E_pad - E)))

    params = jnp.zeros((8, E_pad), jnp.float32)
    params = params.at[0, :E].set(conv_b.astype(jnp.float32))
    params = params.at[1, :E].set(ln_g.astype(jnp.float32))
    params = params.at[2, :E].set(ln_b.astype(jnp.float32))

    grid = (M_pad // tm,)

    out = pl.pallas_call(
        functools.partial(_patch_embed_kernel, e_true=E),
        out_shape=jax.ShapeDtypeStruct((M_pad, E_pad), out_dtype),
        grid_spec=pltpu.PrefetchScalarGridSpec(
            num_scalar_prefetch=0,
            grid=grid,
            in_specs=[
                pl.BlockSpec((tm, K_pad), lambda i: (i, 0)),
                pl.BlockSpec((K_pad, E_pad), lambda i: (0, 0)),
                pl.BlockSpec((8, E_pad), lambda i: (0, 0)),
            ],
            out_specs=pl.BlockSpec((tm, E_pad), lambda i: (i, 0)),
        ),
        compiler_params=pltpu.CompilerParams(
            dimension_semantics=("parallel",),
            vmem_limit_bytes=48 * 1024 * 1024),
    )(patches2d, w2d, params)

    y = out[:M, :E].reshape(B, H_out * W_out, E)
    return y, H_out, W_out


def _reference(x, conv_w, conv_b, ln_g, ln_b, patch_size, stride, matmul_dtype=None):
    pad = patch_size // 2
    xc = x if matmul_dtype is None else x.astype(matmul_dtype)
    wc = conv_w if matmul_dtype is None else conv_w.astype(matmul_dtype)
    y = lax.conv_general_dilated(
        xc, wc, window_strides=(stride, stride),
        padding=((pad, pad), (pad, pad)),
        dimension_numbers=("NCHW", "OIHW", "NCHW"),
        preferred_element_type=jnp.float32)
    y = y + conv_b[None, :, None, None].astype(jnp.float32)
    B, E, Ho, Wo = y.shape
    y = jnp.transpose(y.reshape(B, E, Ho * Wo), (0, 2, 1))   # b (h w) c
    mean = jnp.mean(y, axis=-1, keepdims=True)
    var = jnp.mean(jnp.square(y - mean), axis=-1, keepdims=True)
    y = (y - mean) * lax.rsqrt(var + 1e-5) * ln_g + ln_b
    return y.astype(x.dtype), Ho, Wo


if __name__ == "__main__":
    # small shapes consistent with the first backbone stage (patch_size=7, stride=4)
    B, C, H, W = 2, 4, 16, 16
    patch_size, stride = 7, 4
    embed_dim = 32

    key = jax.random.PRNGKey(0)
    kx, kw, kb = jax.random.split(key, 3)
    x = jax.random.normal(kx, (B, C, H, W), dtype=jnp.float32)

    # deterministic parameter init (kaiming-ish for conv, LN weight=1 / bias=0)
    fan_out = embed_dim * patch_size * patch_size
    conv_w = jax.random.normal(kw, (embed_dim, C, patch_size, patch_size),
                               dtype=jnp.float32) * (2.0 / fan_out) ** 0.5
    conv_b = jax.random.normal(kb, (embed_dim,), dtype=jnp.float32) * 0.02
    ln_g = jnp.ones((embed_dim,), dtype=jnp.float32)
    ln_b = jnp.zeros((embed_dim,), dtype=jnp.float32)

    y, h, w = overlap_patch_embed_forward(
        x, conv_w, conv_b, ln_g, ln_b, patch_size=patch_size, stride=stride)
    y = jax.block_until_ready(y)

    # tight check against a reference with identical (bf16) matmul input rounding
    y_bf, h_bf, w_bf = _reference(x, conv_w, conv_b, ln_g, ln_b, patch_size, stride,
                                  matmul_dtype=jnp.bfloat16)
    # loose check against the full-f32 reference (semantics preserved up to bf16
    # rounding of the projection inputs)
    y_f32, h_ref, w_ref = _reference(x, conv_w, conv_b, ln_g, ln_b, patch_size, stride)

    assert (h, w) == (h_ref, w_ref) == (h_bf, w_bf), (h, w, h_ref, w_ref)
    assert y.shape == (B, h * w, embed_dim), y.shape
    assert jnp.allclose(y, y_bf, atol=2e-3, rtol=2e-3), \
        float(jnp.max(jnp.abs(y - y_bf)))
    assert jnp.allclose(y, y_f32, atol=5e-2, rtol=5e-2), \
        float(jnp.max(jnp.abs(y - y_f32)))

    print("KERNEL_OK")
</pallas_src>

<mosaic_0001>
module attributes {stable_mosaic.version = 11 : i64} {
  func.func @_patch_embed_kernel(%arg0: i32, %arg1: memref<32x256xbf16, #tpu.memory_space<vmem>>, %arg2: memref<256x128xbf16, #tpu.memory_space<vmem>>, %arg3: memref<8x128xf32, #tpu.memory_space<vmem>>, %arg4: memref<32x128xf32, #tpu.memory_space<vmem>>) attributes {dimension_semantics = [#tpu.dimension_semantics<parallel>], iteration_bounds = array<i64: 1>, scalar_prefetch = 0 : i64, scratch_operands = 0 : i64, tpu.core_type = #tpu.core_type<tc>, window_params = [{transform_indices = @transform_0, window_bounds = array<i64: 32, 256>}, {pipeline_mode = #tpu.pipeline_mode<synchronous>, transform_indices = @transform_1, window_bounds = array<i64: 256, 128>}, {pipeline_mode = #tpu.pipeline_mode<synchronous>, transform_indices = @transform_2, window_bounds = array<i64: 8, 128>}, {transform_indices = @transform_3, window_bounds = array<i64: 32, 128>}]} {
    %c0 = arith.constant 0 : index
    %c0_0 = arith.constant 0 : index
    %0 = vector.load %arg1[%c0, %c0_0] : memref<32x256xbf16, #tpu.memory_space<vmem>>, vector<32x256xbf16>
    %c0_1 = arith.constant 0 : index
    %c0_2 = arith.constant 0 : index
    %1 = vector.load %arg2[%c0_1, %c0_2] : memref<256x128xbf16, #tpu.memory_space<vmem>>, vector<256x128xbf16>
    %cst = arith.constant dense<0.000000e+00> : vector<32x128xf32>
    %2 = tpu.matmul %0, %1, %cst {dimension_numbers = #tpu.dot_dimension_numbers<[1], [0], [0], [1], [0, 0, 1, 1], [], []>} : vector<32x256xbf16>, vector<256x128xbf16>, vector<32x128xf32> -> vector<32x128xf32>
    %c0_3 = arith.constant 0 : index
    %c0_4 = arith.constant 0 : index
    %3 = vector.load %arg3[%c0_3, %c0_4] : memref<8x128xf32, #tpu.memory_space<vmem>>, vector<1x128xf32>
    %c1 = arith.constant 1 : index
    %c0_5 = arith.constant 0 : index
    %4 = vector.load %arg3[%c1, %c0_5] : memref<8x128xf32, #tpu.memory_space<vmem>>, vector<1x128xf32>
    %c2 = arith.constant 2 : index
    %c0_6 = arith.constant 0 : index
    %5 = vector.load %arg3[%c2, %c0_6] : memref<8x128xf32, #tpu.memory_space<vmem>>, vector<1x128xf32>
    %6 = vector.broadcast %3 : vector<1x128xf32> to vector<32x128xf32>
    %7 = arith.addf %2, %6 : vector<32x128xf32>
    %cst_7 = arith.constant dense<0.000000e+00> : vector<32xf32>
    %8 = vector.multi_reduction <add>, %7, %cst_7 [1] : vector<32x128xf32> to vector<32xf32>
    %9 = vector.shape_cast %8 : vector<32xf32> to vector<32x1xf32>
    %cst_8 = arith.constant 3.125000e-02 : f32
    %10 = vector.broadcast %cst_8 : f32 to vector<32x1xf32>
    %11 = arith.mulf %9, %10 : vector<32x1xf32>
    %12 = vector.broadcast %11 : vector<32x1xf32> to vector<32x128xf32>
    %13 = arith.subf %7, %12 : vector<32x128xf32>
    %14 = tpu.iota {dimensions = array<i32: 1>} : vector<32x128xi32>
    %c32_i32 = arith.constant 32 : i32
    %15 = vector.broadcast %c32_i32 : i32 to vector<32x128xi32>
    %16 = arith.cmpi slt, %14, %15 : vector<32x128xi32>
    %cst_9 = arith.constant 0.000000e+00 : f32
    %17 = vector.broadcast %cst_9 : f32 to vector<32x128xf32>
    %18 = arith.select %16, %13, %17 : vector<32x128xi1>, vector<32x128xf32>
    %19 = arith.mulf %18, %18 : vector<32x128xf32>
    %cst_10 = arith.constant dense<0.000000e+00> : vector<32xf32>
    %20 = vector.multi_reduction <add>, %19, %cst_10 [1] : vector<32x128xf32> to vector<32xf32>
    %21 = vector.shape_cast %20 : vector<32xf32> to vector<32x1xf32>
    %cst_11 = arith.constant 3.125000e-02 : f32
    %22 = vector.broadcast %cst_11 : f32 to vector<32x1xf32>
    %23 = arith.mulf %21, %22 : vector<32x1xf32>
    %cst_12 = arith.constant 9.99999974E-6 : f32
    %24 = vector.broadcast %cst_12 : f32 to vector<32x1xf32>
    %25 = arith.addf %23, %24 : vector<32x1xf32>
    %26 = math.rsqrt %25 : vector<32x1xf32>
    %27 = vector.broadcast %26 : vector<32x1xf32> to vector<32x128xf32>
    %28 = arith.mulf %13, %27 : vector<32x128xf32>
    %29 = vector.broadcast %4 : vector<1x128xf32> to vector<32x128xf32>
    %30 = arith.mulf %28, %29 : vector<32x128xf32>
    %31 = vector.broadcast %5 : vector<1x128xf32> to vector<32x128xf32>
    %32 = arith.addf %30, %31 : vector<32x128xf32>
    %c0_13 = arith.constant 0 : index
    %c0_14 = arith.constant 0 : index
    %33 = vector.load %arg4[%c0_13, %c0_14] : memref<32x128xf32, #tpu.memory_space<vmem>>, vector<32x128xf32>
    tpu.vector_store %arg4[%c0_13, %c0_14], %32 {strides = array<i32>} : memref<32x128xf32, #tpu.memory_space<vmem>>, vector<32x128xf32>,
    return
  }
  func.func @transform_0(%arg0: i32) -> (i32, i32) {
    %c0_i32 = arith.constant 0 : i32
    %c0_i32_0 = arith.constant 0 : i32
    return %arg0, %c0_i32 : i32, i32
  }
  func.func @transform_1(%arg0: i32) -> (i32, i32) {
    %c0_i32 = arith.constant 0 : i32
    %c0_i32_0 = arith.constant 0 : i32
    %c0_i32_1 = arith.constant 0 : i32
    return %c0_i32, %c0_i32_0 : i32, i32
  }
  func.func @transform_2(%arg0: i32) -> (i32, i32) {
    %c0_i32 = arith.constant 0 : i32
    %c0_i32_0 = arith.constant 0 : i32
    %c0_i32_1 = arith.constant 0 : i32
    return %c0_i32, %c0_i32_0 : i32, i32
  }
  func.func @transform_3(%arg0: i32) -> (i32, i32) {
    %c0_i32 = arith.constant 0 : i32
    %c0_i32_0 = arith.constant 0 : i32
    return %arg0, %c0_i32 : i32, i32
  }
}

</mosaic_0001>

<bundles_post_ra>
// kernel: overlap_patch_embed_forward.1
= control target key start
LH: loop header
LB: loop body
LE: loop exit
PB: predicated region body
PF: predicated region fallthrough
CT: control target
= control target key end

     0   :  { %s532_s0 = inlined_call_operand.vmem [shape: bf16[32,256], index: 0, kind: input, shape index: {}]   ;;  %s533_s1 = inlined_call_operand.vmem [shape: bf16[256,128], index: 1, kind: input, shape index: {}]   ;;  %s534_s2 = inlined_call_operand.vmem [shape: f32[8,128], index: 2, kind: input, shape index: {}]   ;;  %s535_s3 = inlined_call_operand.hbm [shape: f32[32,128], index: 3, kind: output, shape index: {}]  }
   0x1   :  { %v381_v0 = vld [vmem:[%s533_s1 + $0x78] sm:$0xff]   ;;  %v383_v2 = vld [vmem:[%s533_s1 + $0x70] sm:$0xff]   ;;  %v385_v4 = vld [vmem:[%s533_s1 + $0x68] sm:$0xff]  }
   0x2   :  { %v382_v1 = vld [vmem:[%s533_s1 + $0x38] sm:$0xff]   ;;  %334 = vmatprep.subr.bf16.mxu0 %v381_v0  ;;  %362 = vmatprep.subr.bf16.mxu1 %v381_v0  ;;  %v384_v3 = vld [vmem:[%s533_s1 + $0x30] sm:$0xff]   ;;  %v386_v5 = vld [vmem:[%s533_s1 + $0x28] sm:$0xff]  }
   0x3   :  { %335 = vmatpush3.bf16.msra.mxu0 %v382_v1  ;;  %370 = vmatpush3.bf16.msra.mxu1 %v382_v1  ;;  %v387_v6 = vld [vmem:[%s533_s1 + $0x60] sm:$0xff]   ;;  %v389_v8 = vld [vmem:[%s533_s1 + $0x58] sm:$0xff]   ;;  %v391_v10 = vld [vmem:[%s533_s1 + $0x50] sm:$0xff]  }
   0x4   :  { %336 = vmatprep.subr.bf16.mxu0 %v383_v2  ;;  %363 = vmatprep.subr.bf16.mxu1 %v383_v2  ;;  %v388_v7 = vld [vmem:[%s533_s1 + $0x20] sm:$0xff]   ;;  %v390_v9 = vld [vmem:[%s533_s1 + $0x18] sm:$0xff]  }
   0x5   :  { %v399_v11 = vld [vmem:[%s532_s0 + $0x4] ss:$8 sps:$4 sm:$0xff]   ;;  %v402_v12 = vld [vmem:[%s532_s0 + $0x14] ss:$8 sps:$4 sm:$0xff]  }
   0x7   :  { %337 = vmatpush3.bf16.msra.mxu0 %v384_v3  ;;  %371 = vmatpush3.bf16.msra.mxu1 %v384_v3 }
   0x8   :  { %338 = vmatprep.subr.bf16.mxu0 %v385_v4  ;;  %364 = vmatprep.subr.bf16.mxu1 %v385_v4 }
   0xb   :  { %339 = vmatpush3.bf16.msra.mxu0 %v386_v5  ;;  %372 = vmatpush3.bf16.msra.mxu1 %v386_v5 }
   0xc   :  { %340 = vmatprep.subr.bf16.mxu0 %v387_v6  ;;  %365 = vmatprep.subr.bf16.mxu1 %v387_v6 }
   0xf   :  { %341 = vmatpush3.bf16.msra.mxu0 %v388_v7  ;;  %373 = vmatpush3.bf16.msra.mxu1 %v388_v7 }
  0x10   :  { %342 = vmatprep.subr.bf16.mxu0 %v389_v8  ;;  %366 = vmatprep.subr.bf16.mxu1 %v389_v8 }
  0x11   :  { %8 = vsyncpa [#allocation3], 0  ;;  %v392_v13 = vld [vmem:[%s533_s1 + $0x10] sm:$0xff]   ;;  %v393_v14 = vld [vmem:[%s533_s1 + $0x48] sm:$0xff]   ;;  %207 = vmatprep.mubr.bf16.mxu0 %v399_v11  ;;  %215 = vmatprep.mubr.bf16.mxu1 %v402_v12  ;;  %v240_v37 = vlaneseq  ;;  %s433_s29 = smov [#allocation2]  }
  0x12   :  { %v394_v15 = vld [vmem:[%s533_s1 + $0x8] sm:$0xff]   ;;  %v395_v16 = vld [vmem:[%s533_s1 + $0x40] sm:$0xff]   ;;  %v400_v19 = vld [vmem:[%s532_s0 + $0x10] ss:$8 sps:$4 sm:$0xff]   ;;  %s300_s30 = sshll.u32 %s433_s29, 4  ;;  %s301_s30 = int_to_ptr.vmem [resolvable:$true] %s300_s30 }
  0x13   :  { %343 = vmatpush3.bf16.msra.mxu0 %v390_v9  ;;  %374 = vmatpush3.bf16.msra.mxu1 %v390_v9  ;;  %v396_v17 = vld [vmem:[%s533_s1] sm:$0xff]   ;;  %v241_v38 = vand.u32 127, %v240_v37  ;;  %p416_p1 = scmp.lt.s32.totalorder %s301_s30, %s301_s30 }
  0x14   :  { %344 = vmatprep.subr.bf16.mxu0 %v391_v10  ;;  %367 = vmatprep.subr.bf16.mxu1 %v391_v10  ;;  %v397_v18 = vld [vmem:[%s532_s0] ss:$8 sps:$4 sm:$0xff]  }
  0x15   :  { %v311_v24 = vld [vmem:[%s534_s2] ss:$0 sm:$0xff]  ;;  %vm242_vm0 = vcmp.lt.s32.totalorder %v241_v38, 32  ;;  %v332_v8 = vld [vmem:[%s534_s2 + $0x1] ss:$0 sm:$0xff] }
  0x16   :  { %v333_v10 = vld [vmem:[%s534_s2 + $0x2] ss:$0 sm:$0xff]  ;;  %s411_s2 = scalar_lea.vmem %s301_s30, 512 }
  0x17   :  { %345 = vmatpush3.bf16.msra.mxu0 %v392_v13  ;;  %375 = vmatpush3.bf16.msra.mxu1 %v392_v13  ;;  %p412_p0 = scmp.ne.s32.totalorder %s301_s30, %s411_s2  ;;  %p417_p2 = scmp.lt.s32.totalorder %s411_s2, %s411_s2 }
  0x18   :  { %346 = vmatprep.subr.bf16.mxu0 %v393_v14  ;;  %368 = vmatprep.subr.bf16.mxu1 %v393_v14 }
  0x19   :  { %p418_p3 = por %p417_p2, %p416_p1 }
  0x1b   :  { %347 = vmatpush3.bf16.msra.mxu0 %v394_v15  ;;  %376 = vmatpush3.bf16.msra.mxu1 %v394_v15  ;;  %p419_p4 = pnand %p418_p3, %p412_p0 }
  0x1c   :  { %348 = vmatprep.subr.bf16.mxu0 %v395_v16  ;;  %369 = vmatprep.subr.bf16.mxu1 %v395_v16 }
  0x1f   :  { %349 = vmatpush3.bf16.msra.mxu0 %v396_v17  ;;  %377 = vmatpush3.bf16.msra.mxu1 %v396_v17 }
  0x22   :  { %208 = vmatmul.mubr.bf16.vlgmr.msra.gmra.mxu0 %v397_v18  ;;  %216 = vmatmul.mubr.bf16.vlgmr.msra.gmra.mxu1 %v400_v19 }
  0xe2   :  { %v350_v20 = vpop.f32.mrf.mxu0  ;;  %v356_v21 = vpop.f32.mrf.mxu1 }
  0xe4   :  { %v351_v22 = vpop.f32.mrf.mxu0  ;;  %v357_v23 = vpop.f32.mrf.mxu1 }
  0xe5   :  { %v352_v25 = vadd.f32 %v351_v22, %v350_v20  ;;  %v358_v26 = vadd.f32 %v357_v23, %v356_v21 }
  0xe6   :  { %v353_v27 = vpop.f32.mrf.mxu0  ;;  %v359_v28 = vpop.f32.mrf.mxu1 }
  0xe7   :  { %v218_v29 = vadd.f32 %v358_v26, %v311_v24  ;;  %v210_v30 = vadd.f32 %v352_v25, %v311_v24 }
  0xe8   :  { %v354_v31 = vpop.f32.mrf.mxu0  ;;  %v360_v32 = vpop.f32.mrf.mxu1 }
  0xe9   :  { %v355_v33 = vadd.f32 %v354_v31, %v353_v27  ;;  %v361_v34 = vadd.f32 %v360_v32, %v359_v28  ;;  %228 = vadd.xlane.f32.xlu1 %v218_v29  ;;  %224 = vadd.xlane.f32.xlu0 %v210_v30 }
  0xeb   :  { %v221_v35 = vadd.f32 %v361_v34, %v311_v24  ;;  %v213_v36 = vadd.f32 %v355_v33, %v311_v24 }
  0xed   :  { %230 = vadd.xlane.f32.xlu1 %v221_v35  ;;  %226 = vadd.xlane.f32.xlu0 %v213_v36 }
 0x172   :  { %v229_v39 = vpop.xlane.xlu1 %228  ;;  %v225_v40 = vpop.xlane.xlu0 %224 }
 0x173   :  { %v234_v41 = vmul.f32 0.03125, %v229_v39  ;;  %v232_v42 = vmul.f32 0.03125, %v225_v40 }
 0x175   :  { %v238_v43 = vsub.f32 %v218_v29, %v234_v41  ;;  %v236_v44 = vsub.f32 %v210_v30, %v232_v42 }
 0x176   :  { %v231_v45 = vpop.xlane.xlu1 %230  ;;  %v227_v46 = vpop.xlane.xlu0 %226 }
 0x177   :  { %v235_v47 = vmul.f32 0.03125, %v231_v45  ;;  %v233_v48 = vmul.f32 0.03125, %v227_v46  ;;  %v243_v49 = vsel %vm242_vm0, %v236_v44, 0.0  ;;  %v245_v53 = vsel %vm242_vm0, %v238_v43, 0.0 }
 0x178   :  { %v247_v50 = vmul.f32 %v243_v49, %v243_v49  ;;  %v249_v55 = vmul.f32 %v245_v53, %v245_v53 }
 0x179   :  { %v239_v51 = vsub.f32 %v221_v35, %v235_v47  ;;  %v237_v52 = vsub.f32 %v213_v36, %v233_v48 }
 0x17a   :  { %251 = vadd.xlane.f32.xlu0 %v247_v50 }
 0x17b   :  { %v244_v54 = vsel %vm242_vm0, %v237_v52, 0.0  ;;  %v246_v57 = vsel %vm242_vm0, %v239_v51, 0.0 }
 0x17c   :  { %v248_v56 = vmul.f32 %v244_v54, %v244_v54  ;;  %v250_v58 = vmul.f32 %v246_v57, %v246_v57 }
 0x17e   :  { %255 = vadd.xlane.f32.xlu0 %v249_v55  ;;  %253 = vadd.xlane.f32.xlu1 %v248_v56 }
 0x182   :  { %257 = vadd.xlane.f32.xlu1 %v250_v58 }
 0x203   :  { %v252_v59 = vpop.xlane.xlu0 %251 }
 0x204   :  { %v259_v60 = vmul.f32 0.03125, %v252_v59 }
 0x206   :  { %v263_v61 = vadd.f32 1e-05, %v259_v60 }
 0x207   :  { %v254_v62 = vpop.xlane.xlu1 %253  ;;  %v256_v63 = vpop.xlane.xlu0 %255 }
 0x208   :  { %403 = vrsqrt.f32 %v263_v61  ;;  %v260_v0 = vmul.f32 0.03125, %v254_v62  ;;  %v261_v1 = vmul.f32 0.03125, %v256_v63 }
 0x20a   :  { %v264_v2 = vadd.f32 1e-05, %v260_v0  ;;  %v265_v3 = vadd.f32 1e-05, %v261_v1 }
 0x20b   :  { %v258_v4 = vpop.xlane.xlu1 %257 }
 0x20c   :  { %405 = vrsqrt.f32 %v264_v2  ;;  %v262_v5 = vmul.f32 0.03125, %v258_v4 }
 0x20d   :  { %407 = vrsqrt.f32 %v265_v3 }
 0x20e   :  { %v266_v6 = vadd.f32 1e-05, %v262_v5 }
 0x210   :  { %409 = vrsqrt.f32 %v266_v6 }
 0x215   :  { %v404_v7 = vpop.eup %403 }
 0x216   :  { %v271_v9 = vmul.f32 %v404_v7, %v236_v44 }
 0x218   :  { %v279_v11 = vmul.f32 %v332_v8, %v271_v9 }
 0x219   :  { %v406_v12 = vpop.eup %405 }
 0x21a   :  { %v408_v13 = vpop.eup %407  ;;  %v272_v14 = vmul.f32 %v406_v12, %v237_v52  ;;  %v287_v15 = vadd.f32 %v333_v10, %v279_v11 }
 0x21b   :  { %v273_v16 = vmul.f32 %v408_v13, %v238_v43 }
 0x21c   :  { %v280_v17 = vmul.f32 %v332_v8, %v272_v14  ;;  %291 = vst [vmem:[#allocation2] sm:$0xff] %v287_v15 }
 0x21d   :  { %v410_v18 = vpop.eup %409  ;;  %v281_v19 = vmul.f32 %v332_v8, %v273_v16 }
 0x21e   :  { %v274_v20 = vmul.f32 %v410_v18, %v239_v51  ;;  %v288_v21 = vadd.f32 %v333_v10, %v280_v17 }
 0x21f   :  { %v289_v22 = vadd.f32 %v333_v10, %v281_v19 }
 0x220   :  { %v282_v23 = vmul.f32 %v332_v8, %v274_v20  ;;  %292 = vst [vmem:[#allocation2 + $0x8] sm:$0xff] %v288_v21 }
 0x221   :  { %293 = vst [vmem:[#allocation2 + $0x10] sm:$0xff] %v289_v22 }
 0x222   :  { %v290_v24 = vadd.f32 %v333_v10, %v282_v23 }
 0x224   :  { %294 = vst [vmem:[#allocation2 + $0x18] sm:$0xff] %v290_v24 }
 0x225   :  { %422 = shalt.err (!%p419_p4)
}
 0x226   :  { %s434_s4 = smov 128   ;;  %s435_s5 = smov 8  }
 0x227   :  { %306 = dma.vmem_to_hbm [thread:$0]  %s301_s30, 512, %s535_s3, [#allocation3], %s434_s4, %s434_s4, %s435_s5  }
 0x228   :  { %431 = dma.done.wait [#allocation3], 512  }
 0x229   :  { %432 = vsyncadd [#allocation3], 4294966784 }
 0x22a   :  { %310 = vsyncpa [#allocation3], 1 }

</bundles_post_ra>
